<compile_context>
chip_gen: v7x
topology: tpu7x:2x2x1
jax: 0.10.0
libtpu: 0.0.40
codegen_flags: <defaults>
</compile_context>

<pallas_src>
import functools

import numpy as np

import jax
import jax.numpy as jnp
from jax.experimental import pallas as pl
from jax.experimental.pallas import tpu as pltpu


def _styleconv_kernel(x_ref, noise_ref, wmat_ref, nmod_ref, style_ref,
                      mask_ref, o_ref, *, H, W, C_in, C_out, K, b_tile, eps):
    """One batch tile per grid step, channel-major (C, H*W) layout.

    x_ref    : (b_tile, C_in, H*W)        input, flattened spatial on lanes
    noise_ref: (b_tile, C_out, H*W)       pre-drawn Gaussian noise
    wmat_ref : (C_out, K*K*C_in)          conv weight, matmul layout
    nmod_ref : (C_out, 1)                 noise_modulation parameter
    style_ref: (1, 2*C_out, b_tile)       precomputed style = Linear(w)
    mask_ref : (K*K, H*W)                 static halo validity masks
    o_ref    : (b_tile, C_out, H*W)       output
    """
    HW = H * W
    pad = K // 2

    wmat = wmat_ref[...]        # (C_out, K*K*C_in)
    nmod = nmod_ref[...]        # (C_out, 1)
    style = style_ref[0]        # (2*C_out, b_tile)
    mask = mask_ref[...]        # (K*K, HW)

    # --- im2col in registers: static lane shifts + boundary masks (no HBM pad)
    per_b = []
    for b in range(b_tile):
        xf = x_ref[b]                                   # (C_in, HW)
        taps = []
        for ky in range(K):
            for kx in range(K):
                dy, dx = ky - pad, kx - pad
                d = dy * W + dx
                if d == 0:
                    sh = xf
                elif d > 0:
                    sh = jnp.concatenate(
                        [xf[:, d:], jnp.zeros((C_in, d), xf.dtype)], axis=-1)
                else:
                    sh = jnp.concatenate(
                        [jnp.zeros((C_in, -d), xf.dtype), xf[:, :HW + d]],
                        axis=-1)
                if dy == 0 and dx == 0:
                    taps.append(sh)
                else:
                    t = ky * K + kx
                    taps.append(sh * mask[t:t + 1, :])
        per_b.append(jnp.concatenate(taps, axis=0))     # (K*K*C_in, HW)
    patches = per_b[0] if b_tile == 1 else jnp.concatenate(per_b, axis=-1)

    # --- single fused MXU matmul: (C_out, KKC) @ (KKC, b_tile*HW) ---
    conv = jnp.dot(wmat, patches, preferred_element_type=jnp.float32)

    # NOTE: conv bias is intentionally omitted — instance norm subtracts the
    # per-channel spatial mean, so a per-channel constant bias cancels exactly.
    for b in range(b_tile):
        y = conv[:, b * HW:(b + 1) * HW]                # (C_out, HW)
        y = y + nmod * noise_ref[b]                     # noise injection

        # AdaIN: per-(batch, channel) instance norm over spatial dims.
        mean = jnp.mean(y, axis=-1, keepdims=True)
        var = jnp.mean((y - mean) ** 2, axis=-1, keepdims=True)
        xhat = (y - mean) * jax.lax.rsqrt(var + eps)

        mu = style[:C_out, b:b + 1]                     # (C_out, 1)
        sigma = style[C_out:2 * C_out, b:b + 1]         # (C_out, 1)
        o_ref[b] = (sigma * xhat + mu).astype(o_ref.dtype)


def _pick_b_tile(N, C_in, C_out, K, HW, budget_bytes=8 * 1024 * 1024):
    """Largest divisor of N whose per-step working set fits a VMEM budget."""
    per = 4 * HW * (2 * (C_in + 2 * C_out)       # double-buffered x/noise/out
                    + K * K * C_in + C_out)      # in-kernel patches + conv
    bt = max(1, min(N, budget_bytes // max(per, 1)))
    while N % bt:
        bt -= 1
    return bt


def styleconv_forward(x_nchw, w_latent, noise_nchw, params, *, eps=1e-5):
    """params = (conv_w [Co,Ci,K,K], conv_b [Co], style_w [2Co,wd],
                 style_b [2Co], noise_mod [1,Co,1,1])."""
    conv_w, conv_b, style_w, style_b, noise_mod = params
    del conv_b  # cancels exactly under the AdaIN mean subtraction
    N, C_in, H, W = x_nchw.shape
    C_out = conv_w.shape[0]
    K = conv_w.shape[2]
    pad = K // 2
    HW = H * W

    # Channel-major (C, H*W) layout: free reshapes from NCHW, no transposes/pads.
    x = x_nchw.reshape(N, C_in, HW)
    noise = noise_nchw.reshape(N, C_out, HW)
    wmat = jnp.transpose(conv_w, (0, 2, 3, 1)).reshape(C_out, K * K * C_in)
    nmod = noise_mod.reshape(C_out, 1)

    # Hoisted style Linear: one batched GEMM instead of per-step M=1 matmuls.
    style = w_latent @ style_w.T + style_b                      # (N, 2*C_out)

    b_tile = _pick_b_tile(N, C_in, C_out, K, HW)
    n_tiles = N // b_tile
    style_blk = style.reshape(n_tiles, b_tile, 2 * C_out)       # tiny tensor
    style_blk = jnp.transpose(style_blk, (0, 2, 1))             # (nt, 2Co, bt)

    # Static halo-validity masks for the K*K taps (computed once, 9*HW floats).
    yy, xx = np.meshgrid(np.arange(H), np.arange(W), indexing="ij")
    mask_np = np.zeros((K * K, HW), np.float32)
    for ky in range(K):
        for kx in range(K):
            dy, dx = ky - pad, kx - pad
            valid = ((yy + dy >= 0) & (yy + dy < H) &
                     (xx + dx >= 0) & (xx + dx < W))
            mask_np[ky * K + kx] = valid.reshape(-1).astype(np.float32)
    mask = jnp.asarray(mask_np)

    kernel = functools.partial(_styleconv_kernel, H=H, W=W, C_in=C_in,
                               C_out=C_out, K=K, b_tile=b_tile, eps=eps)

    out = pl.pallas_call(
        kernel,
        out_shape=jax.ShapeDtypeStruct((N, C_out, HW), jnp.float32),
        grid_spec=pltpu.PrefetchScalarGridSpec(
            num_scalar_prefetch=0,
            grid=(n_tiles,),
            in_specs=[
                pl.BlockSpec((b_tile, C_in, HW), lambda i: (i, 0, 0)),
                pl.BlockSpec((b_tile, C_out, HW), lambda i: (i, 0, 0)),
                pl.BlockSpec((C_out, K * K * C_in), lambda i: (0, 0)),
                pl.BlockSpec((C_out, 1), lambda i: (0, 0)),
                pl.BlockSpec((1, 2 * C_out, b_tile), lambda i: (i, 0, 0)),
                pl.BlockSpec((K * K, HW), lambda i: (0, 0)),
            ],
            out_specs=pl.BlockSpec((b_tile, C_out, HW), lambda i: (i, 0, 0)),
        ),
        compiler_params=pltpu.CompilerParams(
            dimension_semantics=("parallel",)),
    )(x, noise, wmat, nmod, style_blk, mask)

    return out.reshape(N, C_out, H, W)


def styleconv_reference(x_nchw, w_latent, noise_nchw, params, eps=1e-5):
    """Pure-JAX reference for correctness checking."""
    conv_w, conv_b, style_w, style_b, noise_mod = params
    C_out = conv_b.shape[0]
    y = jax.lax.conv_general_dilated(
        x_nchw, conv_w, window_strides=(1, 1), padding='SAME',
        dimension_numbers=('NCHW', 'OIHW', 'NCHW'))
    y = y + conv_b[None, :, None, None]
    y = y + noise_mod.reshape(1, C_out, 1, 1) * noise_nchw
    style = w_latent @ style_w.T + style_b
    mu = style[:, :C_out][:, :, None, None]
    sigma = style[:, C_out:2 * C_out][:, :, None, None]
    mean = jnp.mean(y, axis=(2, 3), keepdims=True)
    var = jnp.mean((y - mean) ** 2, axis=(2, 3), keepdims=True)
    return sigma * (y - mean) * jax.lax.rsqrt(var + eps) + mu


if __name__ == "__main__":
    # Small shapes consistent with the module: batch=2, nc_in=4, nc_out=8,
    # spatial 16x16, w_dim=32, k=3.
    N, C_in, C_out, H, W, w_dim, K = 2, 4, 8, 16, 16, 32, 3

    key = jax.random.PRNGKey(0)
    kx, kw, kn, kcw, kcb, ksw, ksb, knm = jax.random.split(key, 8)

    x = jax.random.normal(kx, (N, C_in, H, W), jnp.float32)
    w_latent = jax.random.normal(kw, (N, w_dim), jnp.float32)
    # torch.randn(x.shape)-style noise, drawn deterministically here (kept
    # external to match the module's RNG semantics exactly).
    noise = jax.random.normal(kn, (N, C_out, H, W), jnp.float32)

    conv_w = 0.1 * jax.random.normal(kcw, (C_out, C_in, K, K), jnp.float32)
    conv_b = 0.1 * jax.random.normal(kcb, (C_out,), jnp.float32)
    style_w = 0.1 * jax.random.normal(ksw, (2 * C_out, w_dim), jnp.float32)
    style_b = 0.1 * jax.random.normal(ksb, (2 * C_out,), jnp.float32)
    noise_mod = 0.01 * jax.random.normal(knm, (1, C_out, 1, 1), jnp.float32)
    params = (conv_w, conv_b, style_w, style_b, noise_mod)

    out = styleconv_forward(x, w_latent, noise, params)
    out = jax.block_until_ready(out)

    ref = styleconv_reference(x, w_latent, noise, params)
    assert out.shape == (N, C_out, H, W)
    assert jnp.allclose(out, ref, atol=1e-4, rtol=1e-4), \
        f"max err {jnp.max(jnp.abs(out - ref))}"

    print("KERNEL_OK")
</pallas_src>

<mosaic_0001>
module attributes {stable_mosaic.version = 11 : i64} {
  func.func @_styleconv_kernel(%arg0: i32, %arg1: memref<2x4x256xf32, #tpu.memory_space<vmem>>, %arg2: memref<2x8x256xf32, #tpu.memory_space<vmem>>, %arg3: memref<8x36xf32, #tpu.memory_space<vmem>>, %arg4: memref<8x1xf32, #tpu.memory_space<vmem>>, %arg5: memref<1x16x2xf32, #tpu.memory_space<vmem>>, %arg6: memref<9x256xf32, #tpu.memory_space<vmem>>, %arg7: memref<2x8x256xf32, #tpu.memory_space<vmem>>) attributes {dimension_semantics = [#tpu.dimension_semantics<parallel>], iteration_bounds = array<i64: 1>, scalar_prefetch = 0 : i64, scratch_operands = 0 : i64, tpu.core_type = #tpu.core_type<tc>, window_params = [{transform_indices = @transform_0, window_bounds = array<i64: 2, 4, 256>}, {transform_indices = @transform_1, window_bounds = array<i64: 2, 8, 256>}, {pipeline_mode = #tpu.pipeline_mode<synchronous>, transform_indices = @transform_2, window_bounds = array<i64: 8, 36>}, {pipeline_mode = #tpu.pipeline_mode<synchronous>, transform_indices = @transform_3, window_bounds = array<i64: 8, 1>}, {transform_indices = @transform_4, window_bounds = array<i64: 1, 16, 2>}, {pipeline_mode = #tpu.pipeline_mode<synchronous>, transform_indices = @transform_5, window_bounds = array<i64: 9, 256>}, {transform_indices = @transform_6, window_bounds = array<i64: 2, 8, 256>}]} {
    %c0 = arith.constant 0 : index
    %c0_0 = arith.constant 0 : index
    %0 = vector.load %arg3[%c0, %c0_0] : memref<8x36xf32, #tpu.memory_space<vmem>>, vector<8x36xf32>
    %c0_1 = arith.constant 0 : index
    %c0_2 = arith.constant 0 : index
    %1 = vector.load %arg4[%c0_1, %c0_2] : memref<8x1xf32, #tpu.memory_space<vmem>>, vector<8x1xf32>
    %c0_3 = arith.constant 0 : index
    %c0_4 = arith.constant 0 : index
    %c0_5 = arith.constant 0 : index
    %2 = vector.load %arg5[%c0_3, %c0_4, %c0_5] : memref<1x16x2xf32, #tpu.memory_space<vmem>>, vector<1x16x2xf32>
    %3 = vector.shape_cast %2 : vector<1x16x2xf32> to vector<16x2xf32>
    %c0_6 = arith.constant 0 : index
    %c0_7 = arith.constant 0 : index
    %4 = vector.load %arg6[%c0_6, %c0_7] : memref<9x256xf32, #tpu.memory_space<vmem>>, vector<9x256xf32>
    %c0_8 = arith.constant 0 : index
    %c0_9 = arith.constant 0 : index
    %c0_10 = arith.constant 0 : index
    %5 = vector.load %arg1[%c0_8, %c0_9, %c0_10] : memref<2x4x256xf32, #tpu.memory_space<vmem>>, vector<1x4x256xf32>
    %6 = vector.shape_cast %5 : vector<1x4x256xf32> to vector<4x256xf32>
    %cst = arith.constant 0.000000e+00 : f32
    %7 = vector.broadcast %cst : f32 to vector<4x17xf32>
    %8 = vector.extract_strided_slice %6 {offsets = [0, 0], sizes = [4, 239], strides = [1, 1]} : vector<4x256xf32> to vector<4x239xf32>
    %9 = tpu.concatenate %7, %8 in 1 : vector<4x17xf32>, vector<4x239xf32> -> vector<4x256xf32>
    %10 = vector.extract_strided_slice %4 {offsets = [0, 0], sizes = [1, 256], strides = [1, 1]} : vector<9x256xf32> to vector<1x256xf32>
    %11 = vector.broadcast %10 : vector<1x256xf32> to vector<4x256xf32>
    %12 = arith.mulf %9, %11 : vector<4x256xf32>
    %cst_11 = arith.constant 0.000000e+00 : f32
    %13 = vector.broadcast %cst_11 : f32 to vector<4x16xf32>
    %14 = vector.extract_strided_slice %6 {offsets = [0, 0], sizes = [4, 240], strides = [1, 1]} : vector<4x256xf32> to vector<4x240xf32>
    %15 = tpu.concatenate %13, %14 in 1 : vector<4x16xf32>, vector<4x240xf32> -> vector<4x256xf32>
    %16 = vector.extract_strided_slice %4 {offsets = [1, 0], sizes = [1, 256], strides = [1, 1]} : vector<9x256xf32> to vector<1x256xf32>
    %17 = vector.broadcast %16 : vector<1x256xf32> to vector<4x256xf32>
    %18 = arith.mulf %15, %17 : vector<4x256xf32>
    %cst_12 = arith.constant 0.000000e+00 : f32
    %19 = vector.broadcast %cst_12 : f32 to vector<4x15xf32>
    %20 = vector.extract_strided_slice %6 {offsets = [0, 0], sizes = [4, 241], strides = [1, 1]} : vector<4x256xf32> to vector<4x241xf32>
    %21 = tpu.concatenate %19, %20 in 1 : vector<4x15xf32>, vector<4x241xf32> -> vector<4x256xf32>
    %22 = vector.extract_strided_slice %4 {offsets = [2, 0], sizes = [1, 256], strides = [1, 1]} : vector<9x256xf32> to vector<1x256xf32>
    %23 = vector.broadcast %22 : vector<1x256xf32> to vector<4x256xf32>
    %24 = arith.mulf %21, %23 : vector<4x256xf32>
    %cst_13 = arith.constant 0.000000e+00 : f32
    %25 = vector.broadcast %cst_13 : f32 to vector<4x1xf32>
    %26 = vector.extract_strided_slice %6 {offsets = [0, 0], sizes = [4, 255], strides = [1, 1]} : vector<4x256xf32> to vector<4x255xf32>
    %27 = tpu.concatenate %25, %26 in 1 : vector<4x1xf32>, vector<4x255xf32> -> vector<4x256xf32>
    %28 = vector.extract_strided_slice %4 {offsets = [3, 0], sizes = [1, 256], strides = [1, 1]} : vector<9x256xf32> to vector<1x256xf32>
    %29 = vector.broadcast %28 : vector<1x256xf32> to vector<4x256xf32>
    %30 = arith.mulf %27, %29 : vector<4x256xf32>
    %31 = vector.extract_strided_slice %6 {offsets = [0, 1], sizes = [4, 255], strides = [1, 1]} : vector<4x256xf32> to vector<4x255xf32>
    %cst_14 = arith.constant 0.000000e+00 : f32
    %32 = vector.broadcast %cst_14 : f32 to vector<4x1xf32>
    %33 = tpu.concatenate %31, %32 in 1 : vector<4x255xf32>, vector<4x1xf32> -> vector<4x256xf32>
    %34 = vector.extract_strided_slice %4 {offsets = [5, 0], sizes = [1, 256], strides = [1, 1]} : vector<9x256xf32> to vector<1x256xf32>
    %35 = vector.broadcast %34 : vector<1x256xf32> to vector<4x256xf32>
    %36 = arith.mulf %33, %35 : vector<4x256xf32>
    %37 = vector.extract_strided_slice %6 {offsets = [0, 15], sizes = [4, 241], strides = [1, 1]} : vector<4x256xf32> to vector<4x241xf32>
    %cst_15 = arith.constant 0.000000e+00 : f32
    %38 = vector.broadcast %cst_15 : f32 to vector<4x15xf32>
    %39 = tpu.concatenate %37, %38 in 1 : vector<4x241xf32>, vector<4x15xf32> -> vector<4x256xf32>
    %40 = vector.extract_strided_slice %4 {offsets = [6, 0], sizes = [1, 256], strides = [1, 1]} : vector<9x256xf32> to vector<1x256xf32>
    %41 = vector.broadcast %40 : vector<1x256xf32> to vector<4x256xf32>
    %42 = arith.mulf %39, %41 : vector<4x256xf32>
    %43 = vector.extract_strided_slice %6 {offsets = [0, 16], sizes = [4, 240], strides = [1, 1]} : vector<4x256xf32> to vector<4x240xf32>
    %cst_16 = arith.constant 0.000000e+00 : f32
    %44 = vector.broadcast %cst_16 : f32 to vector<4x16xf32>
    %45 = tpu.concatenate %43, %44 in 1 : vector<4x240xf32>, vector<4x16xf32> -> vector<4x256xf32>
    %46 = vector.extract_strided_slice %4 {offsets = [7, 0], sizes = [1, 256], strides = [1, 1]} : vector<9x256xf32> to vector<1x256xf32>
    %47 = vector.broadcast %46 : vector<1x256xf32> to vector<4x256xf32>
    %48 = arith.mulf %45, %47 : vector<4x256xf32>
    %49 = vector.extract_strided_slice %6 {offsets = [0, 17], sizes = [4, 239], strides = [1, 1]} : vector<4x256xf32> to vector<4x239xf32>
    %cst_17 = arith.constant 0.000000e+00 : f32
    %50 = vector.broadcast %cst_17 : f32 to vector<4x17xf32>
    %51 = tpu.concatenate %49, %50 in 1 : vector<4x239xf32>, vector<4x17xf32> -> vector<4x256xf32>
    %52 = vector.extract_strided_slice %4 {offsets = [8, 0], sizes = [1, 256], strides = [1, 1]} : vector<9x256xf32> to vector<1x256xf32>
    %53 = vector.broadcast %52 : vector<1x256xf32> to vector<4x256xf32>
    %54 = arith.mulf %51, %53 : vector<4x256xf32>
    %55 = tpu.concatenate %12, %18, %24, %30, %6, %36, %42, %48, %54 in 0 : vector<4x256xf32>, vector<4x256xf32>, vector<4x256xf32>, vector<4x256xf32>, vector<4x256xf32>, vector<4x256xf32>, vector<4x256xf32>, vector<4x256xf32>, vector<4x256xf32> -> vector<36x256xf32>
    %c1 = arith.constant 1 : index
    %c0_18 = arith.constant 0 : index
    %c0_19 = arith.constant 0 : index
    %56 = vector.load %arg1[%c1, %c0_18, %c0_19] : memref<2x4x256xf32, #tpu.memory_space<vmem>>, vector<1x4x256xf32>
    %57 = vector.shape_cast %56 : vector<1x4x256xf32> to vector<4x256xf32>
    %cst_20 = arith.constant 0.000000e+00 : f32
    %58 = vector.broadcast %cst_20 : f32 to vector<4x17xf32>
    %59 = vector.extract_strided_slice %57 {offsets = [0, 0], sizes = [4, 239], strides = [1, 1]} : vector<4x256xf32> to vector<4x239xf32>
    %60 = tpu.concatenate %58, %59 in 1 : vector<4x17xf32>, vector<4x239xf32> -> vector<4x256xf32>
    %61 = vector.extract_strided_slice %4 {offsets = [0, 0], sizes = [1, 256], strides = [1, 1]} : vector<9x256xf32> to vector<1x256xf32>
    %62 = vector.broadcast %61 : vector<1x256xf32> to vector<4x256xf32>
    %63 = arith.mulf %60, %62 : vector<4x256xf32>
    %cst_21 = arith.constant 0.000000e+00 : f32
    %64 = vector.broadcast %cst_21 : f32 to vector<4x16xf32>
    %65 = vector.extract_strided_slice %57 {offsets = [0, 0], sizes = [4, 240], strides = [1, 1]} : vector<4x256xf32> to vector<4x240xf32>
    %66 = tpu.concatenate %64, %65 in 1 : vector<4x16xf32>, vector<4x240xf32> -> vector<4x256xf32>
    %67 = vector.extract_strided_slice %4 {offsets = [1, 0], sizes = [1, 256], strides = [1, 1]} : vector<9x256xf32> to vector<1x256xf32>
    %68 = vector.broadcast %67 : vector<1x256xf32> to vector<4x256xf32>
    %69 = arith.mulf %66, %68 : vector<4x256xf32>
    %cst_22 = arith.constant 0.000000e+00 : f32
    %70 = vector.broadcast %cst_22 : f32 to vector<4x15xf32>
    %71 = vector.extract_strided_slice %57 {offsets = [0, 0], sizes = [4, 241], strides = [1, 1]} : vector<4x256xf32> to vector<4x241xf32>
    %72 = tpu.concatenate %70, %71 in 1 : vector<4x15xf32>, vector<4x241xf32> -> vector<4x256xf32>
    %73 = vector.extract_strided_slice %4 {offsets = [2, 0], sizes = [1, 256], strides = [1, 1]} : vector<9x256xf32> to vector<1x256xf32>
    %74 = vector.broadcast %73 : vector<1x256xf32> to vector<4x256xf32>
    %75 = arith.mulf %72, %74 : vector<4x256xf32>
    %cst_23 = arith.constant 0.000000e+00 : f32
    %76 = vector.broadcast %cst_23 : f32 to vector<4x1xf32>
    %77 = vector.extract_strided_slice %57 {offsets = [0, 0], sizes = [4, 255], strides = [1, 1]} : vector<4x256xf32> to vector<4x255xf32>
    %78 = tpu.concatenate %76, %77 in 1 : vector<4x1xf32>, vector<4x255xf32> -> vector<4x256xf32>
    %79 = vector.extract_strided_slice %4 {offsets = [3, 0], sizes = [1, 256], strides = [1, 1]} : vector<9x256xf32> to vector<1x256xf32>
    %80 = vector.broadcast %79 : vector<1x256xf32> to vector<4x256xf32>
    %81 = arith.mulf %78, %80 : vector<4x256xf32>
    %82 = vector.extract_strided_slice %57 {offsets = [0, 1], sizes = [4, 255], strides = [1, 1]} : vector<4x256xf32> to vector<4x255xf32>
    %cst_24 = arith.constant 0.000000e+00 : f32
    %83 = vector.broadcast %cst_24 : f32 to vector<4x1xf32>
    %84 = tpu.concatenate %82, %83 in 1 : vector<4x255xf32>, vector<4x1xf32> -> vector<4x256xf32>
    %85 = vector.extract_strided_slice %4 {offsets = [5, 0], sizes = [1, 256], strides = [1, 1]} : vector<9x256xf32> to vector<1x256xf32>
    %86 = vector.broadcast %85 : vector<1x256xf32> to vector<4x256xf32>
    %87 = arith.mulf %84, %86 : vector<4x256xf32>
    %88 = vector.extract_strided_slice %57 {offsets = [0, 15], sizes = [4, 241], strides = [1, 1]} : vector<4x256xf32> to vector<4x241xf32>
    %cst_25 = arith.constant 0.000000e+00 : f32
    %89 = vector.broadcast %cst_25 : f32 to vector<4x15xf32>
    %90 = tpu.concatenate %88, %89 in 1 : vector<4x241xf32>, vector<4x15xf32> -> vector<4x256xf32>
    %91 = vector.extract_strided_slice %4 {offsets = [6, 0], sizes = [1, 256], strides = [1, 1]} : vector<9x256xf32> to vector<1x256xf32>
    %92 = vector.broadcast %91 : vector<1x256xf32> to vector<4x256xf32>
    %93 = arith.mulf %90, %92 : vector<4x256xf32>
    %94 = vector.extract_strided_slice %57 {offsets = [0, 16], sizes = [4, 240], strides = [1, 1]} : vector<4x256xf32> to vector<4x240xf32>
    %cst_26 = arith.constant 0.000000e+00 : f32
    %95 = vector.broadcast %cst_26 : f32 to vector<4x16xf32>
    %96 = tpu.concatenate %94, %95 in 1 : vector<4x240xf32>, vector<4x16xf32> -> vector<4x256xf32>
    %97 = vector.extract_strided_slice %4 {offsets = [7, 0], sizes = [1, 256], strides = [1, 1]} : vector<9x256xf32> to vector<1x256xf32>
    %98 = vector.broadcast %97 : vector<1x256xf32> to vector<4x256xf32>
    %99 = arith.mulf %96, %98 : vector<4x256xf32>
    %100 = vector.extract_strided_slice %57 {offsets = [0, 17], sizes = [4, 239], strides = [1, 1]} : vector<4x256xf32> to vector<4x239xf32>
    %cst_27 = arith.constant 0.000000e+00 : f32
    %101 = vector.broadcast %cst_27 : f32 to vector<4x17xf32>
    %102 = tpu.concatenate %100, %101 in 1 : vector<4x239xf32>, vector<4x17xf32> -> vector<4x256xf32>
    %103 = vector.extract_strided_slice %4 {offsets = [8, 0], sizes = [1, 256], strides = [1, 1]} : vector<9x256xf32> to vector<1x256xf32>
    %104 = vector.broadcast %103 : vector<1x256xf32> to vector<4x256xf32>
    %105 = arith.mulf %102, %104 : vector<4x256xf32>
    %106 = tpu.concatenate %63, %69, %75, %81, %57, %87, %93, %99, %105 in 0 : vector<4x256xf32>, vector<4x256xf32>, vector<4x256xf32>, vector<4x256xf32>, vector<4x256xf32>, vector<4x256xf32>, vector<4x256xf32>, vector<4x256xf32>, vector<4x256xf32> -> vector<36x256xf32>
    %107 = tpu.concatenate %55, %106 in 1 : vector<36x256xf32>, vector<36x256xf32> -> vector<36x512xf32>
    %cst_28 = arith.constant dense<0.000000e+00> : vector<8x512xf32>
    %108 = tpu.matmul %0, %107, %cst_28 {dimension_numbers = #tpu.dot_dimension_numbers<[1], [0], [0], [1], [0, 0, 1, 1], [], []>} : vector<8x36xf32>, vector<36x512xf32>, vector<8x512xf32> -> vector<8x512xf32>
    %109 = vector.extract_strided_slice %108 {offsets = [0, 0], sizes = [8, 256], strides = [1, 1]} : vector<8x512xf32> to vector<8x256xf32>
    %c0_29 = arith.constant 0 : index
    %c0_30 = arith.constant 0 : index
    %c0_31 = arith.constant 0 : index
    %110 = vector.load %arg2[%c0_29, %c0_30, %c0_31] : memref<2x8x256xf32, #tpu.memory_space<vmem>>, vector<1x8x256xf32>
    %111 = vector.shape_cast %110 : vector<1x8x256xf32> to vector<8x256xf32>
    %112 = vector.broadcast %1 : vector<8x1xf32> to vector<8x256xf32>
    %113 = arith.mulf %112, %111 : vector<8x256xf32>
    %114 = arith.addf %109, %113 : vector<8x256xf32>
    %cst_32 = arith.constant dense<0.000000e+00> : vector<8xf32>
    %115 = vector.multi_reduction <add>, %114, %cst_32 [1] : vector<8x256xf32> to vector<8xf32>
    %116 = vector.shape_cast %115 : vector<8xf32> to vector<8x1xf32>
    %cst_33 = arith.constant 2.560000e+02 : f32
    %117 = vector.broadcast %cst_33 : f32 to vector<8x1xf32>
    %118 = arith.divf %116, %117 : vector<8x1xf32>
    %119 = vector.broadcast %118 : vector<8x1xf32> to vector<8x256xf32>
    %120 = arith.subf %114, %119 : vector<8x256xf32>
    %121 = arith.mulf %120, %120 : vector<8x256xf32>
    %cst_34 = arith.constant dense<0.000000e+00> : vector<8xf32>
    %122 = vector.multi_reduction <add>, %121, %cst_34 [1] : vector<8x256xf32> to vector<8xf32>
    %123 = vector.shape_cast %122 : vector<8xf32> to vector<8x1xf32>
    %cst_35 = arith.constant 2.560000e+02 : f32
    %124 = vector.broadcast %cst_35 : f32 to vector<8x1xf32>
    %125 = arith.divf %123, %124 : vector<8x1xf32>
    %126 = vector.broadcast %118 : vector<8x1xf32> to vector<8x256xf32>
    %127 = arith.subf %114, %126 : vector<8x256xf32>
    %cst_36 = arith.constant 9.99999974E-6 : f32
    %128 = vector.broadcast %cst_36 : f32 to vector<8x1xf32>
    %129 = arith.addf %125, %128 : vector<8x1xf32>
    %130 = math.rsqrt %129 : vector<8x1xf32>
    %131 = vector.broadcast %130 : vector<8x1xf32> to vector<8x256xf32>
    %132 = arith.mulf %127, %131 : vector<8x256xf32>
    %133 = vector.extract_strided_slice %3 {offsets = [0, 0], sizes = [8, 1], strides = [1, 1]} : vector<16x2xf32> to vector<8x1xf32>
    %134 = vector.extract_strided_slice %3 {offsets = [8, 0], sizes = [8, 1], strides = [1, 1]} : vector<16x2xf32> to vector<8x1xf32>
    %135 = vector.broadcast %134 : vector<8x1xf32> to vector<8x256xf32>
    %136 = arith.mulf %135, %132 : vector<8x256xf32>
    %137 = vector.broadcast %133 : vector<8x1xf32> to vector<8x256xf32>
    %138 = arith.addf %136, %137 : vector<8x256xf32>
    %c0_37 = arith.constant 0 : index
    %c0_38 = arith.constant 0 : index
    %c0_39 = arith.constant 0 : index
    %139 = vector.load %arg7[%c0_37, %c0_38, %c0_39] : memref<2x8x256xf32, #tpu.memory_space<vmem>>, vector<1x8x256xf32>
    %140 = vector.shape_cast %139 : vector<1x8x256xf32> to vector<8x256xf32>
    %141 = vector.shape_cast %138 : vector<8x256xf32> to vector<1x8x256xf32>
    tpu.vector_store %arg7[%c0_37, %c0_38, %c0_39], %141 {strides = array<i32>} : memref<2x8x256xf32, #tpu.memory_space<vmem>>, vector<1x8x256xf32>,
    %142 = vector.extract_strided_slice %108 {offsets = [0, 256], sizes = [8, 256], strides = [1, 1]} : vector<8x512xf32> to vector<8x256xf32>
    %c1_40 = arith.constant 1 : index
    %c0_41 = arith.constant 0 : index
    %c0_42 = arith.constant 0 : index
    %143 = vector.load %arg2[%c1_40, %c0_41, %c0_42] : memref<2x8x256xf32, #tpu.memory_space<vmem>>, vector<1x8x256xf32>
    %144 = vector.shape_cast %143 : vector<1x8x256xf32> to vector<8x256xf32>
    %145 = vector.broadcast %1 : vector<8x1xf32> to vector<8x256xf32>
    %146 = arith.mulf %145, %144 : vector<8x256xf32>
    %147 = arith.addf %142, %146 : vector<8x256xf32>
    %cst_43 = arith.constant dense<0.000000e+00> : vector<8xf32>
    %148 = vector.multi_reduction <add>, %147, %cst_43 [1] : vector<8x256xf32> to vector<8xf32>
    %149 = vector.shape_cast %148 : vector<8xf32> to vector<8x1xf32>
    %cst_44 = arith.constant 2.560000e+02 : f32
    %150 = vector.broadcast %cst_44 : f32 to vector<8x1xf32>
    %151 = arith.divf %149, %150 : vector<8x1xf32>
    %152 = vector.broadcast %151 : vector<8x1xf32> to vector<8x256xf32>
    %153 = arith.subf %147, %152 : vector<8x256xf32>
    %154 = arith.mulf %153, %153 : vector<8x256xf32>
    %cst_45 = arith.constant dense<0.000000e+00> : vector<8xf32>
    %155 = vector.multi_reduction <add>, %154, %cst_45 [1] : vector<8x256xf32> to vector<8xf32>
    %156 = vector.shape_cast %155 : vector<8xf32> to vector<8x1xf32>
    %cst_46 = arith.constant 2.560000e+02 : f32
    %157 = vector.broadcast %cst_46 : f32 to vector<8x1xf32>
    %158 = arith.divf %156, %157 : vector<8x1xf32>
    %159 = vector.broadcast %151 : vector<8x1xf32> to vector<8x256xf32>
    %160 = arith.subf %147, %159 : vector<8x256xf32>
    %cst_47 = arith.constant 9.99999974E-6 : f32
    %161 = vector.broadcast %cst_47 : f32 to vector<8x1xf32>
    %162 = arith.addf %158, %161 : vector<8x1xf32>
    %163 = math.rsqrt %162 : vector<8x1xf32>
    %164 = vector.broadcast %163 : vector<8x1xf32> to vector<8x256xf32>
    %165 = arith.mulf %160, %164 : vector<8x256xf32>
    %166 = vector.extract_strided_slice %3 {offsets = [0, 1], sizes = [8, 1], strides = [1, 1]} : vector<16x2xf32> to vector<8x1xf32>
    %167 = vector.extract_strided_slice %3 {offsets = [8, 1], sizes = [8, 1], strides = [1, 1]} : vector<16x2xf32> to vector<8x1xf32>
    %168 = vector.broadcast %167 : vector<8x1xf32> to vector<8x256xf32>
    %169 = arith.mulf %168, %165 : vector<8x256xf32>
    %170 = vector.broadcast %166 : vector<8x1xf32> to vector<8x256xf32>
    %171 = arith.addf %169, %170 : vector<8x256xf32>
    %c1_48 = arith.constant 1 : index
    %c0_49 = arith.constant 0 : index
    %c0_50 = arith.constant 0 : index
    %172 = vector.load %arg7[%c1_48, %c0_49, %c0_50] : memref<2x8x256xf32, #tpu.memory_space<vmem>>, vector<1x8x256xf32>
    %173 = vector.shape_cast %172 : vector<1x8x256xf32> to vector<8x256xf32>
    %174 = vector.shape_cast %171 : vector<8x256xf32> to vector<1x8x256xf32>
    tpu.vector_store %arg7[%c1_48, %c0_49, %c0_50], %174 {strides = array<i32>} : memref<2x8x256xf32, #tpu.memory_space<vmem>>, vector<1x8x256xf32>,
    return
  }
  func.func @transform_0(%arg0: i32) -> (i32, i32, i32) {
    %c0_i32 = arith.constant 0 : i32
    %c0_i32_0 = arith.constant 0 : i32
    %c0_i32_1 = arith.constant 0 : i32
    return %arg0, %c0_i32, %c0_i32_0 : i32, i32, i32
  }
  func.func @transform_1(%arg0: i32) -> (i32, i32, i32) {
    %c0_i32 = arith.constant 0 : i32
    %c0_i32_0 = arith.constant 0 : i32
    %c0_i32_1 = arith.constant 0 : i32
    return %arg0, %c0_i32, %c0_i32_0 : i32, i32, i32
  }
  func.func @transform_2(%arg0: i32) -> (i32, i32) {
    %c0_i32 = arith.constant 0 : i32
    %c0_i32_0 = arith.constant 0 : i32
    %c0_i32_1 = arith.constant 0 : i32
    return %c0_i32, %c0_i32_0 : i32, i32
  }
  func.func @transform_3(%arg0: i32) -> (i32, i32) {
    %c0_i32 = arith.constant 0 : i32
    %c0_i32_0 = arith.constant 0 : i32
    %c0_i32_1 = arith.constant 0 : i32
    return %c0_i32, %c0_i32_0 : i32, i32
  }
  func.func @transform_4(%arg0: i32) -> (i32, i32, i32) {
    %c0_i32 = arith.constant 0 : i32
    %c0_i32_0 = arith.constant 0 : i32
    %c0_i32_1 = arith.constant 0 : i32
    return %arg0, %c0_i32, %c0_i32_0 : i32, i32, i32
  }
  func.func @transform_5(%arg0: i32) -> (i32, i32) {
    %c0_i32 = arith.constant 0 : i32
    %c0_i32_0 = arith.constant 0 : i32
    %c0_i32_1 = arith.constant 0 : i32
    return %c0_i32, %c0_i32_0 : i32, i32
  }
  func.func @transform_6(%arg0: i32) -> (i32, i32, i32) {
    %c0_i32 = arith.constant 0 : i32
    %c0_i32_0 = arith.constant 0 : i32
    %c0_i32_1 = arith.constant 0 : i32
    return %arg0, %c0_i32, %c0_i32_0 : i32, i32, i32
  }
}

</mosaic_0001>

<bundles_post_ra>
// kernel: tpu_custom_call.1
= control target key start
LH: loop header
LB: loop body
LE: loop exit
PB: predicated region body
PF: predicated region fallthrough
CT: control target
= control target key end

     0   :  { %11 = vsyncpa [#allocation3], 0  ;;  %s996_s0 = inlined_call_operand.hbm [shape: f32[2,4,256], index: 0, kind: input, shape index: {}]   ;;  %s997_s1 = inlined_call_operand.hbm [shape: f32[2,8,256], index: 1, kind: input, shape index: {}]   ;;  %s998_s2 = inlined_call_operand.vmem [shape: f32[8,36], index: 2, kind: input, shape index: {}]   ;;  %s999_s3 = inlined_call_operand.vmem [shape: f32[8,1], index: 3, kind: input, shape index: {}]   ;;  %s1000_s4 = inlined_call_operand.vmem [shape: f32[1,16,2], index: 4, kind: input, shape index: {}]   ;;  %s1001_s5 = inlined_call_operand.vmem [shape: f32[9,256], index: 5, kind: input, shape index: {}]   ;;  %s1002_s6 = inlined_call_operand.hbm [shape: f32[2,8,256], index: 6, kind: output, shape index: {}]  }
   0x1   :  { %12 = vsyncpa [#allocation6], 0 }
   0x2   :  { %13 = vsyncpa [#allocation4], 0  ;;  %s747_s21 = smov [#allocation2]   ;;  %s675_s25 = scalar_lea.hbm %s996_s0, 256 }
   0x3   :  { %s19_s22 = sshll.u32 %s747_s21, 4  ;;  %p676_p0 = scmp.ne.s32.totalorder %s996_s0, %s675_s25  ;;  %s20_s22 = int_to_ptr.vmem [resolvable:$true] %s19_s22 }
   0x4   :  { %p679_p1 = scmp.lt.u32.totalorder %s675_s25, %s996_s0 }
   0x6   :  { %p681_p2 = pnand %p679_p1, %p676_p0 }
   0x8   :  { %684 = shalt.err (!%p681_p2)
}
   0x9   :  { %s685_s30 = scalar_lea.vmem %s20_s22, 256  ;;  %p690_p4 = scmp.lt.s32.totalorder %s20_s22, %s20_s22 }
   0xa   :  { %p686_p3 = scmp.ne.s32.totalorder %s20_s22, %s685_s30  ;;  %p691_p5 = scmp.lt.s32.totalorder %s685_s30, %s685_s30 }
   0xc   :  { %p692_p6 = por %p691_p5, %p690_p4 }
   0xe   :  { %p693_p7 = pnand %p692_p6, %p686_p3 }
  0x10   :  { %696 = shalt.err (!%p693_p7)
}
  0x11   :  { %s748_s7 = smov 128   ;;  %s749_s8 = smov 8  }
  0x12   :  { %25 = dma.hbm_to_vmem [thread:$0]  %s996_s0, 256, %s20_s22, [#allocation3], %s748_s7, %s748_s7, %s749_s8  }
  0x13   :  { %s750_s11 = smov [#allocation5]   ;;  %s697_s15 = scalar_lea.hbm %s997_s1, 512 }
  0x14   :  { %s31_s12 = sshll.u32 %s750_s11, 4  ;;  %p698_p8 = scmp.ne.s32.totalorder %s997_s1, %s697_s15  ;;  %s32_s12 = int_to_ptr.vmem [resolvable:$true] %s31_s12 }
  0x15   :  { %p701_p9 = scmp.lt.u32.totalorder %s697_s15, %s997_s1 }
  0x17   :  { %p703_p10 = pnand %p701_p9, %p698_p8 }
  0x19   :  { %706 = shalt.err (!%p703_p10)
}
  0x1a   :  { %s707_s20 = scalar_lea.vmem %s32_s12, 512  ;;  %p712_p12 = scmp.lt.s32.totalorder %s32_s12, %s32_s12 }
  0x1b   :  { %p708_p11 = scmp.ne.s32.totalorder %s32_s12, %s707_s20  ;;  %p713_p13 = scmp.lt.s32.totalorder %s707_s20, %s707_s20 }
  0x1d   :  { %p714_p0 = por %p713_p13, %p712_p12 }
  0x1f   :  { %p715_p1 = pnand %p714_p0, %p708_p11 }
  0x21   :  { %718 = shalt.err (!%p715_p1)
}
  0x22   :  { %s751_s0 = smov 256   ;;  %s752_s21 = smov 16  }
  0x23   :  { %37 = dma.hbm_to_vmem [thread:$0]  %s997_s1, 512, %s32_s12, [#allocation6], %s751_s0, %s751_s0, %s752_s21  }
  0x24   :  { %741 = dma.done.wait [#allocation3], 256  }
  0x25   :  { %742 = vsyncadd [#allocation3], 4294967040 }
  0x26   :  { %743 = dma.done.wait [#allocation6], 512  }
  0x27   :  { %744 = vsyncadd [#allocation6], 4294966784  ;;  %v826_v0 = vld [vmem:[#allocation2] sm:$0xff]  ;;  %s753_s24 = smov 1   ;;  %v835_v2 = vld [vmem:[#allocation2 + $0x8] sm:$0xff]  ;;  %s754_s1 = smov 17   ;;  %v72_v9 = vlaneseq }
  0x28   :  { %120 = vrot.lane.b32.xlu1 %v826_v0, %s753_s24  ;;  %82 = vrot.lane.b32.xlu0 %v826_v0, %s752_s21  ;;  %v833_v1 = vcombine.high %v826_v0, %v826_v0  ;;  %v842_v3 = vcombine.high %v835_v2, %v835_v2  ;;  %s755_s25 = smov 15   ;;  %s756_s26 = smov 112   ;;  %v759_v4 = vmov 0.0   ;;  %v760_v5 = vmov 0   ;;  %v53_v6 = vld [vmem:[%s999_s3] sm:$0xff]  ;;  %v889_v18 = vld [vmem:[%s1001_s5 + $0x8] sm:$0xff] }
  0x29   :  { %s757_s27 = smov 127   ;;  %s758_s28 = smov 113   ;;  %446 = vmatprep.mubr.f32.mxu0 %v759_v4  ;;  %517 = vmatprep.mubr.f32.mxu1 %v759_v4  ;;  %v877_v12 = vshrl.u32 %v72_v9, 7  ;;  %v884_v17 = vld [vmem:[%s1001_s5] sm:$0xff]  ;;  %vm124_vm0 = vcmask 7168   ;;  %vm86_vm1 = vcmask 130048  }
  0x2a   :  { %665 = vset.pattern.permute.xlu0 %v760_v5  ;;  %666 = vset.pattern.permute.xlu1 %v760_v5  ;;  %s761_s29 = smov 111   ;;  %vm67_vm2 = vcmask 138240   ;;  %vm105_vm3 = vcmask 121856   ;;  %vm240_vm4 = vcmask 1043456   ;;  %vm143_vm5 = vcmask 1039360  }
  0x2b   :  { %v131_v15 = vsub.s32 3, %v877_v12  ;;  %v93_v16 = vsub.s32 1, %v877_v12  ;;  %v74_v21 = vsub.s32 0, %v877_v12  ;;  %v112_v28 = vsub.s32 2, %v877_v12 }
  0x2c   :  { %263 = vrot.lane.b32.xlu0 %v835_v2, %s752_s21  ;;  %122 = vrot.lane.b32.xlu1 %v833_v1, %s753_s24  ;;  %vm181_vm6 = vcmask 916480   ;;  %vm162_vm7 = vcmask 924672   ;;  %vm200_vm8 = vcmask 908288   ;;  %vm366_vm9 = vcmask 293888  }
  0x2d   :  { %v132_v22 = vrot.slane %v884_v17, %v131_v15  ;;  %v94_v23 = vrot.slane %v884_v17, %v93_v16  ;;  %v136_v24 = vrot.slane %v889_v18, %v131_v15  ;;  %v98_v25 = vrot.slane %v889_v18, %v93_v16 }
  0x2e   :  { %v75_v33 = vrot.slane %v884_v17, %v74_v21  ;;  %v79_v34 = vrot.slane %v889_v18, %v74_v21  ;;  %v113_v41 = vrot.slane %v884_v17, %v112_v28  ;;  %v117_v42 = vrot.slane %v889_v18, %v112_v28 }
  0x30   :  { %265 = vrot.lane.b32.xlu1 %v842_v3, %s752_s21  ;;  %84 = vrot.lane.b32.xlu0 %v833_v1, %s752_s21 }
  0x34   :  { %285 = vrot.lane.b32.xlu1 %v842_v3, %s753_s24  ;;  %283 = vrot.lane.b32.xlu0 %v835_v2, %s753_s24 }
  0x38   :  { %65 = vrot.lane.b32.xlu1 %v833_v1, %s754_s1  ;;  %63 = vrot.lane.b32.xlu0 %v826_v0, %s754_s1 }
  0x3c   :  { %103 = vrot.lane.b32.xlu1 %v833_v1, %s755_s25  ;;  %101 = vrot.lane.b32.xlu0 %v826_v0, %s755_s25 }
  0x40   :  { %255 = vrot.lane.b32.xlu1 %v842_v3, %s754_s1  ;;  %253 = vrot.lane.b32.xlu0 %v835_v2, %s754_s1 }
  0x44   :  { %275 = vrot.lane.b32.xlu1 %v842_v3, %s755_s25  ;;  %273 = vrot.lane.b32.xlu0 %v835_v2, %s755_s25 }
  0x48   :  { %179 = vrot.lane.b32.xlu1 %v833_v1, %s756_s26  ;;  %141 = vrot.lane.b32.xlu0 %v833_v1, %s757_s27 }
  0x4c   :  { %315 = vrot.lane.b32.xlu1 %v842_v3, %s756_s26  ;;  %295 = vrot.lane.b32.xlu0 %v842_v3, %s757_s27 }
  0x50   :  { %177 = vrot.lane.b32.xlu1 %v826_v0, %s756_s26  ;;  %139 = vrot.lane.b32.xlu0 %v826_v0, %s757_s27 }
  0x54   :  { %313 = vrot.lane.b32.xlu1 %v835_v2, %s756_s26  ;;  %293 = vrot.lane.b32.xlu0 %v835_v2, %s757_s27 }
  0x58   :  { %305 = vrot.lane.b32.xlu1 %v842_v3, %s758_s28  ;;  %160 = vrot.lane.b32.xlu0 %v833_v1, %s758_s28 }
  0x5c   :  { %303 = vrot.lane.b32.xlu1 %v835_v2, %s758_s28  ;;  %158 = vrot.lane.b32.xlu0 %v826_v0, %s758_s28 }
  0x60   :  { %325 = vrot.lane.b32.xlu1 %v842_v3, %s761_s29  ;;  %198 = vrot.lane.b32.xlu0 %v833_v1, %s761_s29 }
  0x64   :  { %323 = vrot.lane.b32.xlu1 %v835_v2, %s761_s29  ;;  %196 = vrot.lane.b32.xlu0 %v826_v0, %s761_s29 }
  0x68   :  { %528 = vperm.xlu0 %665, %v53_v6  }
  0x9a   :  { %v121_v7 = vpop.permute.xlu1 %120  ;;  %v83_v8 = vpop.permute.xlu0 %82 }
  0x9b   :  { %v128_v26 = vsel %vm124_vm0, 0.0, %v121_v7  ;;  %v90_v27 = vsel %vm86_vm1, 0.0, %v83_v8 }
  0x9c   :  { %v137_v35 = vmul.f32 %v132_v22, %v128_v26  ;;  %v99_v36 = vmul.f32 %v94_v23, %v90_v27 }
  0x9e   :  { %v264_v10 = vpop.permute.xlu0 %263  ;;  %v123_v11 = vpop.permute.xlu1 %122  ;;  %v223_v49 = vrot.slane %v137_v35, 4  ;;  %v217_v50 = vrot.slane %v99_v36, 4  ;;  %v150_v36 = vsub.s32 5, %v877_v12 }
  0x9f   :  { %v125_v29 = vsel %vm124_vm0, %v121_v7, %v123_v11  ;;  %v270_v43 = vsel %vm86_vm1, 0.0, %v264_v10 }
  0xa0   :  { %v138_v39 = vmul.f32 %v136_v24, %v125_v29  ;;  %v271_v57 = vmul.f32 %v270_v43, %v94_v23 }
  0xa2   :  { %v266_v13 = vpop.permute.xlu1 %265  ;;  %v85_v14 = vpop.permute.xlu0 %84  ;;  %v224_v53 = vrot.slane %v138_v39, 4  ;;  %v188_v39 = vsub.s32 7, %v877_v12 }
  0xa3   :  { %v87_v30 = vsel %vm86_vm1, %v83_v8, %v85_v14  ;;  %v267_v44 = vsel %vm86_vm1, %v264_v10, %v266_v13 }
  0xa4   :  { %v100_v40 = vmul.f32 %v98_v25, %v87_v30  ;;  %v272_v58 = vmul.f32 %v267_v44, %v98_v25 }
  0xa6   :  { %v286_v19 = vpop.permute.xlu1 %285  ;;  %v284_v20 = vpop.permute.xlu0 %283  ;;  %v218_v54 = vrot.slane %v100_v40, 4  ;;  %v336_v21 = vrot.slane %v272_v58, 4  ;;  %v155_v40 = vrot.slane %v889_v18, %v150_v36  ;;  %v189_v58 = vrot.slane %v884_v17, %v188_v39 }
  0xa7   :  { %v287_v59 = vsel %vm124_vm0, %v284_v20, %v286_v19  ;;  %v290_v60 = vsel %vm124_vm0, 0.0, %v284_v20  ;;  %v335_v20 = vrot.slane %v271_v57, 4 }
  0xa8   :  { %v291_v11 = vmul.f32 %v290_v60, %v132_v22  ;;  %v292_v13 = vmul.f32 %v287_v59, %v136_v24 }
  0xaa   :  { %v66_v31 = vpop.permute.xlu1 %65  ;;  %v64_v32 = vpop.permute.xlu0 %63  ;;  %v341_v26 = vrot.slane %v291_v11, 4  ;;  %v342_v27 = vrot.slane %v292_v13, 4 }
  0xab   :  { %v68_v37 = vsel %vm67_vm2, %v64_v32, %v66_v31  ;;  %v71_v38 = vsel %vm67_vm2, 0.0, %v64_v32 }
  0xac   :  { %v80_v45 = vmul.f32 %v75_v33, %v71_v38  ;;  %v81_v46 = vmul.f32 %v79_v34, %v68_v37 }
  0xae   :  { %v104_v47 = vpop.permute.xlu1 %103  ;;  %v102_v48 = vpop.permute.xlu0 %101  ;;  %v242_v63 = vsel %vm240_vm4, %v81_v46, %v218_v54  ;;  %v241_v5 = vsel %vm240_vm4, %v80_v45, %v217_v50  ;;  %v193_v45 = vrot.slane %v889_v18, %v188_v39 }
  0xaf   :  { %v106_v51 = vsel %vm105_vm3, %v102_v48, %v104_v47  ;;  %v109_v52 = vsel %vm105_vm3, 0.0, %v102_v48  ;;  %v169_v48 = vsub.s32 6, %v877_v12 }
  0xb0   :  { %v118_v55 = vmul.f32 %v113_v41, %v109_v52  ;;  %v119_v56 = vmul.f32 %v117_v42, %v106_v51  ;;  %v151_v51 = vrot.slane %v884_v17, %v150_v36 }
  0xb1   :  { %v174_v59 = vrot.slane %v889_v18, %v169_v48 }
  0xb2   :  { %v256_v61 = vpop.permute.xlu1 %255  ;;  %v254_v62 = vpop.permute.xlu0 %253  ;;  %v244_v4 = vsel %vm240_vm4, %v119_v56, %v224_v53  ;;  %v243_v6 = vsel %vm240_vm4, %v118_v55, %v223_v49 }
  0xb3   :  { %v257_v7 = vsel %vm67_vm2, %v254_v62, %v256_v61  ;;  %v260_v8 = vsel %vm67_vm2, 0.0, %v254_v62  ;;  %v632_v9 = vpack.c.bf16 %v244_v4, %v242_v63  ;;  %v634_v10 = vpack.c.bf16 %v243_v6, %v241_v5 }
  0xb4   :  { %v261_v14 = vmul.f32 %v260_v8, %v75_v33  ;;  %v262_v15 = vmul.f32 %v257_v7, %v79_v34  ;;  %v170_v7 = vrot.slane %v884_v17, %v169_v48 }
  0xb5   :  { %633 = vmatprep.subr.bf16.mxu0 %v632_v9 }
  0xb6   :  { %v276_v16 = vpop.permute.xlu1 %275  ;;  %v274_v19 = vpop.permute.xlu0 %273  ;;  %635 = vmatpush1.bf16.msra.mxu0 %v634_v10  ;;  %v359_v22 = vsel %vm240_vm4, %v262_v15, %v336_v21  ;;  %v358_v32 = vsel %vm240_vm4, %v261_v14, %v335_v20 }
  0xb7   :  { %v277_v23 = vsel %vm105_vm3, %v274_v19, %v276_v16  ;;  %v280_v25 = vsel %vm105_vm3, 0.0, %v274_v19 }
  0xb8   :  { %v281_v28 = vmul.f32 %v280_v25, %v113_v41  ;;  %v282_v29 = vmul.f32 %v277_v23, %v117_v42 }
  0xba   :  { %v180_v30 = vpop.permute.xlu1 %179  ;;  %v142_v31 = vpop.permute.xlu0 %141  ;;  %v361_v24 = vsel %vm240_vm4, %v282_v29, %v342_v27  ;;  %v360_v33 = vsel %vm240_vm4, %v281_v28, %v341_v26 }
  0xbb   :  { %v640_v34 = vpack.c.bf16 %v361_v24, %v359_v22  ;;  %v642_v35 = vpack.c.bf16 %v360_v33, %v358_v32  ;;  %v147_v41 = vsel %vm143_vm5, %v142_v31, 0.0  ;;  %v185_v46 = vsel %vm181_vm6, %v180_v30, 0.0 }
  0xbc   :  { %v157_v49 = vmul.f32 %v155_v40, %v147_v41  ;;  %v195_v54 = vmul.f32 %v193_v45, %v185_v46 }
  0xbd   :  { %641 = vmatprep.subr.bf16.mxu1 %v640_v34 }
  0xbe   :  { %v316_v37 = vpop.permute.xlu1 %315  ;;  %v296_v38 = vpop.permute.xlu0 %295  ;;  %643 = vmatpush1.bf16.msra.mxu1 %v642_v35  ;;  %v231_v60 = vrot.slane %v157_v49, 4  ;;  %v237_v8 = vrot.slane %v195_v54, 4  ;;  %v52_v49 = vld [vmem:[%s998_s2] sm:$0xff]  ;;  %v570_v54 = vld [vmem:[#allocation5 + $0x18] sm:$0xff] }
  0xbf   :  { %v300_v42 = vsel %vm143_vm5, %v296_v38, 0.0  ;;  %v320_v47 = vsel %vm181_vm6, %v316_v37, 0.0 }
  0xc0   :  { %v302_v50 = vmul.f32 %v300_v42, %v155_v40  ;;  %v322_v55 = vmul.f32 %v320_v47, %v193_v45  ;;  %v246_v16 = vsel %vm240_vm4, %v833_v1, %v231_v60 }
  0xc2   :  { %v178_v43 = vpop.permute.xlu1 %177  ;;  %v140_v44 = vpop.permute.xlu0 %139  ;;  %v349_v61 = vrot.slane %v302_v50, 4  ;;  %v355_v9 = vrot.slane %v322_v55, 4 }
  0xc3   :  { %v144_v56 = vsel %vm143_vm5, %v140_v44, %v142_v31  ;;  %v182_v12 = vsel %vm181_vm6, %v178_v43, %v180_v30 }
  0xc4   :  { %v156_v63 = vmul.f32 %v151_v51, %v144_v56  ;;  %v194_v13 = vmul.f32 %v189_v58, %v182_v12  ;;  %v363_v19 = vsel %vm240_vm4, %v842_v3, %v349_v61  ;;  %v625_v3 = vld [vmem:[%s1001_s5 + $0x18] ss:$0 sm:$0xff] }
  0xc6   :  { %v314_v52 = vpop.permute.xlu1 %313  ;;  %v294_v53 = vpop.permute.xlu0 %293  ;;  %v230_v20 = vrot.slane %v156_v63, 4  ;;  %v236_v31 = vrot.slane %v194_v13, 4 }
  0xc7   :  { %v297_v57 = vsel %vm143_vm5, %v294_v53, %v296_v38  ;;  %v317_v62 = vsel %vm181_vm6, %v314_v52, %v316_v37  ;;  %v569_v52 = vld [vmem:[#allocation5 + $0x10] sm:$0xff]  ;;  %v525_v53 = vld [vmem:[#allocation5 + $0x8] sm:$0xff] }
  0xc8   :  { %v301_v4 = vmul.f32 %v297_v57, %v151_v51  ;;  %v321_v18 = vmul.f32 %v317_v62, %v189_v58  ;;  %v245_v34 = vsel %vm240_vm4, %v826_v0, %v230_v20  ;;  %v624_v0 = vld [vmem:[%s1001_s5 + $0x10] ss:$0 sm:$0xff] }
  0xc9   :  { %v524_v51 = vld [vmem:[#allocation5] sm:$0xff] }
  0xca   :  { %v306_v5 = vpop.permute.xlu1 %305  ;;  %v161_v6 = vpop.permute.xlu0 %160  ;;  %v348_v21 = vrot.slane %v301_v4, 4  ;;  %v354_v1 = vrot.slane %v321_v18, 4 }
  0xcb   :  { %v310_v10 = vsel %vm162_vm7, %v306_v5, 0.0  ;;  %v166_v11 = vsel %vm162_vm7, %v161_v6, 0.0 }
  0xcc   :  { %v312_v14 = vmul.f32 %v310_v10, %v174_v59  ;;  %v176_v15 = vmul.f32 %v174_v59, %v166_v11  ;;  %v362_v36 = vsel %vm240_vm4, %v835_v2, %v348_v21 }
  0xce   :  { %v304_v17 = vpop.permute.xlu1 %303  ;;  %v159_v23 = vpop.permute.xlu0 %158  ;;  %v248_v25 = vsel %vm240_vm4, %v176_v15, %v237_v8  ;;  %v365_v26 = vsel %vm240_vm4, %v312_v14, %v355_v9  ;;  %v55_v8 = vld [vmem:[%s1000_s4 + $0x8] sm:$0xff]  ;;  %v762_v9 = vmov 1  }
  0xcf   :  { %v307_v27 = vsel %vm162_vm7, %v304_v17, %v306_v5  ;;  %v163_v28 = vsel %vm162_vm7, %v159_v23, %v161_v6  ;;  %v636_v29 = vpack.c.bf16 %v248_v25, %v246_v16  ;;  %v644_v30 = vpack.c.bf16 %v365_v26, %v363_v19  ;;  %667 = vset.pattern.permute.xlu0 %v762_v9 }
  0xd0   :  { %v311_v22 = vmul.f32 %v307_v27, %v170_v7  ;;  %v175_v24 = vmul.f32 %v170_v7, %v163_v28  ;;  %v54_v27 = vld [vmem:[%s1000_s4] sm:$0xff]  ;;  %s763_s4 = smov [#allocation7]  }
  0xd1   :  { %637 = vmatprep.subr.bf16.mxu0 %v636_v29  ;;  %645 = vmatprep.subr.bf16.mxu1 %v644_v30  ;;  %s611_s19 = sshll.u32 %s763_s4, 4  ;;  %s612_s19 = int_to_ptr.vmem [resolvable:$true] %s611_s19 }
  0xd2   :  { %v326_v32 = vpop.permute.xlu1 %325  ;;  %v199_v33 = vpop.permute.xlu0 %198  ;;  %v247_v35 = vsel %vm240_vm4, %v175_v24, %v236_v31  ;;  %v364_v37 = vsel %vm240_vm4, %v311_v22, %v354_v1  ;;  %s719_s20 = scalar_lea.vmem %s612_s19, 512  ;;  %p724_p3 = scmp.lt.s32.totalorder %s612_s19, %s612_s19 }
  0xd3   :  { %v330_v38 = vsel %vm200_vm8, %v326_v32, 0.0  ;;  %v204_v39 = vsel %vm200_vm8, %v199_v33, 0.0  ;;  %v638_v40 = vpack.c.bf16 %v247_v35, %v245_v34  ;;  %v646_v41 = vpack.c.bf16 %v364_v37, %v362_v36  ;;  %p720_p2 = scmp.ne.s32.totalorder %s612_s19, %s719_s20  ;;  %p725_p4 = scmp.lt.s32.totalorder %s719_s20, %s719_s20 }
  0xd4   :  { %v332_v42 = vmul.f32 %v625_v3, %v330_v38  ;;  %v214_v43 = vmul.f32 %v625_v3, %v204_v39 }
  0xd5   :  { %639 = vmatpush1.bf16.msra.mxu0 %v638_v40  ;;  %647 = vmatpush1.bf16.msra.mxu1 %v646_v41  ;;  %p726_p5 = por %p725_p4, %p724_p3 }
  0xd6   :  { %v324_v44 = vpop.permute.xlu1 %323  ;;  %v197_v45 = vpop.permute.xlu0 %196  ;;  %626 = vmatprep.subr.msk.mxu0 %vm240_vm4, %v214_v43  ;;  %629 = vmatprep.subr.msk.mxu1 %vm240_vm4, %v332_v42 }
  0xd7   :  { %v327_v2 = vsel %vm200_vm8, %v324_v44, %v326_v32  ;;  %v201_v46 = vsel %vm200_vm8, %v197_v45, %v199_v33  ;;  %p727_p6 = pnand %p726_p5, %p720_p2 }
  0xd8   :  { %v331_v47 = vmul.f32 %v624_v0, %v327_v2  ;;  %v213_v48 = vmul.f32 %v624_v0, %v201_v46 }
  0xda   :  { %627 = vmatpush1.msk.msra.mxu0 %vm240_vm4, %v213_v48  ;;  %630 = vmatpush1.msk.msra.mxu1 %vm240_vm4, %v331_v47 }
  0xdb   :  { %628 = vmatmul.mubr.msk.f32.vlgmr.msra.gmra.mrb[0].mxu0 %vm366_vm9, %v52_v49  ;;  %631 = vmatmul.mubr.msk.f32.vlgmr.msra.gmra.mrb[0].mxu1 %vm366_vm9, %v52_v49 }
  0xe7   :  { %v529_v50 = vpop.permute.xlu0 %528 }
  0xe8   :  { %v531_v55 = vmul.f32 %v529_v50, %v524_v51  ;;  %v571_v56 = vmul.f32 %v569_v52, %v529_v50  ;;  %v532_v57 = vmul.f32 %v529_v50, %v525_v53  ;;  %v572_v58 = vmul.f32 %v570_v54, %v529_v50 }
 0x1ae   :  { %v448_v59 = vpop.f32.mrb[0].mxu0  ;;  %v519_v60 = vpop.f32.mrb[0].mxu1 }
 0x1af   :  { %v533_v61 = vadd.f32 %v531_v55, %v448_v59  ;;  %v573_v12 = vadd.f32 %v571_v56, %v519_v60  ;;  %v450_v62 = vpop.f32.mrb[1].mxu0  ;;  %v521_v63 = vpop.f32.mrb[1].mxu1 }
 0x1b0   :  { %v534_v4 = vadd.f32 %v532_v57, %v450_v62  ;;  %v574_v5 = vadd.f32 %v572_v58, %v521_v63 }
 0x1b2   :  { %v575_v6 = vadd.f32 %v574_v5, %v573_v12  ;;  %v535_v7 = vadd.f32 %v534_v4, %v533_v61 }
 0x1b4   :  { %576 = vadd.xlane.f32.xlu0 %v575_v6  ;;  %536 = vadd.xlane.f32.xlu1 %v535_v7 }
 0x1c5   :  { %554 = vperm.xlu1 %666, %v55_v8  }
 0x241   :  { %v577_v10 = vpop.xlane.xlu0 %576  ;;  %v537_v11 = vpop.xlane.xlu1 %536 }
 0x242   :  { %v578_v13 = vmul.f32 0.00390625, %v577_v10  ;;  %v539_v18 = vmul.f32 0.00390625, %v537_v11 }
 0x244   :  { %v579_v14 = vsub.f32 %v573_v12, %v578_v13  ;;  %v580_v15 = vsub.f32 %v574_v5, %v578_v13  ;;  %v540_v16 = vsub.f32 %v533_v61, %v539_v18  ;;  %v541_v19 = vsub.f32 %v534_v4, %v539_v18 }
 0x245   :  { %v555_v28 = vpop.permute.xlu1 %554 }
 0x246   :  { %v581_v20 = vmul.f32 %v579_v14, %v579_v14  ;;  %v582_v21 = vmul.f32 %v580_v15, %v580_v15  ;;  %v542_v17 = vmul.f32 %v540_v16, %v540_v16  ;;  %v543_v23 = vmul.f32 %v541_v19, %v541_v19 }
 0x248   :  { %v583_v25 = vadd.f32 %v582_v21, %v581_v20  ;;  %v544_v26 = vadd.f32 %v543_v23, %v542_v17 }
 0x24a   :  { %584 = vadd.xlane.f32.xlu0 %v583_v25  ;;  %545 = vadd.xlane.f32.xlu1 %v544_v26 }
 0x25b   :  { %561 = vperm.xlu1 %666, %v54_v27  }
 0x25f   :  { %668 = vset.pattern.permute.xlu1 %v762_v9 }
 0x260   :  { %592 = vperm.xlu0 %667, %v55_v8   ;;  %598 = vperm.xlu1 %668, %v54_v27  }
 0x2d7   :  { %v585_v29 = vpop.xlane.xlu0 %584  ;;  %v546_v30 = vpop.xlane.xlu1 %545 }
 0x2d8   :  { %v586_v31 = vmul.f32 0.00390625, %v585_v29  ;;  %v547_v1 = vmul.f32 0.00390625, %v546_v30 }
 0x2da   :  { %v587_v22 = vadd.f32 1e-05, %v586_v31  ;;  %v548_v24 = vadd.f32 1e-05, %v547_v1 }
 0x2db   :  { %v562_v3 = vpop.permute.xlu1 %561 }
 0x2dc   :  { %671 = vrsqrt.f32 %v587_v22 }
 0x2dd   :  { %673 = vrsqrt.f32 %v548_v24 }
 0x2df   :  { %v593_v33 = vpop.permute.xlu0 %592  ;;  %v599_v39 = vpop.permute.xlu1 %598 }
 0x2e6   :  { %v672_v32 = vpop.eup %671 }
 0x2e7   :  { %v674_v34 = vpop.eup %673  ;;  %v589_v35 = vmul.f32 %v672_v32, %v579_v14  ;;  %v590_v36 = vmul.f32 %v672_v32, %v580_v15 }
 0x2e8   :  { %v550_v37 = vmul.f32 %v674_v34, %v540_v16  ;;  %v551_v38 = vmul.f32 %v674_v34, %v541_v19 }
 0x2e9   :  { %v595_v40 = vmul.f32 %v593_v33, %v589_v35  ;;  %v596_v41 = vmul.f32 %v593_v33, %v590_v36 }
 0x2ea   :  { %v557_v42 = vmul.f32 %v555_v28, %v550_v37  ;;  %v558_v43 = vmul.f32 %v555_v28, %v551_v38 }
 0x2eb   :  { %v601_v0 = vadd.f32 %v599_v39, %v595_v40  ;;  %v602_v44 = vadd.f32 %v599_v39, %v596_v41 }
 0x2ec   :  { %v564_v45 = vadd.f32 %v562_v3, %v557_v42  ;;  %v565_v2 = vadd.f32 %v562_v3, %v558_v43 }
 0x2ed   :  { %604 = vst [vmem:[#allocation7 + $0x10] sm:$0xff] %v601_v0  ;;  %605 = vst [vmem:[#allocation7 + $0x18] sm:$0xff] %v602_v44 }
 0x2ee   :  { %566 = vst [vmem:[#allocation7] sm:$0xff] %v564_v45  ;;  %567 = vst [vmem:[#allocation7 + $0x8] sm:$0xff] %v565_v2 }
 0x2ef   :  { %730 = shalt.err (!%p727_p6)
}
 0x2f0   :  { %s731_s24 = scalar_lea.hbm %s1002_s6, 512 }
 0x2f1   :  { %p732_p7 = scmp.ne.s32.totalorder %s1002_s6, %s731_s24  ;;  %p735_p8 = scmp.lt.u32.totalorder %s731_s24, %s1002_s6 }
 0x2f3   :  { %p737_p9 = pnand %p735_p8, %p732_p7 }
 0x2f5   :  { %740 = shalt.err (!%p737_p9)
}
 0x2f6   :  { %617 = dma.vmem_to_hbm [thread:$0]  %s612_s19, 512, %s1002_s6, [#allocation4], %s751_s0, %s751_s0, %s752_s21  }
 0x2f7   :  { %745 = dma.done.wait [#allocation4], 512  }
 0x2f8   :  { %746 = vsyncadd [#allocation4], 4294966784 }
 0x2f9   :  { %621 = vsyncpa [#allocation3], 1 }
 0x2fa   :  { %622 = vsyncpa [#allocation6], 1 }
 0x2fb   :  { %623 = vsyncpa [#allocation4], 1 }

</bundles_post_ra>
